<compile_context>
chip_gen: v7x
topology: tpu7x:2x2x1
jax: 0.10.0
libtpu: 0.0.40
codegen_flags: <defaults>
</compile_context>

<pallas_src>
import functools

import jax
import jax.numpy as jnp
import numpy as np
from jax.experimental import pallas as pl
from jax.experimental.pallas import tpu as pltpu

_LANE = 128
_SUBLANE = 8
# One block's budget (input or output).  4 MiB blocks -> ~16 MiB of
# double-buffered in+out VMEM, safely inside the 32 MiB scoped limit we
# request below on every TPU generation.
_MAX_BLOCK_BYTES = 4 << 20
_VMEM_LIMIT_BYTES = 32 << 20


# ----------------------------------------------------------------------------
# Kernel 1: elementwise affine hot path  out = scale * (x + loc)
#   x: (R, T) packed rows; loc/scale: (R, 1) broadcast over the lane axis.
# ----------------------------------------------------------------------------
def _affine_kernel(x_ref, loc_ref, scale_ref, out_ref):
    out_ref[...] = (scale_ref[...] * (x_ref[...] + loc_ref[...])).astype(out_ref.dtype)


# ----------------------------------------------------------------------------
# Kernel 2 (init path, pass 1): per-row sums.
# ----------------------------------------------------------------------------
def _row_sum_kernel(x_ref, out_ref, acc_ref):
    t = pl.program_id(1)

    @pl.when(t == 0)
    def _():
        acc_ref[...] = jnp.zeros_like(acc_ref)

    acc_ref[...] += jnp.sum(x_ref[...].astype(jnp.float32), axis=1, keepdims=True)

    @pl.when(t == pl.num_programs(1) - 1)
    def _():
        out_ref[...] = acc_ref[...]


# ----------------------------------------------------------------------------
# Kernel 3 (init path, pass 2): per-row sum of squared deviations from the
# per-row (i.e. per-channel) mean supplied by the wrapper.
# ----------------------------------------------------------------------------
def _row_sq_dev_kernel(x_ref, mu_ref, out_ref, acc_ref):
    t = pl.program_id(1)

    @pl.when(t == 0)
    def _():
        acc_ref[...] = jnp.zeros_like(acc_ref)

    d = x_ref[...].astype(jnp.float32) - mu_ref[...]
    acc_ref[...] += jnp.sum(d * d, axis=1, keepdims=True)

    @pl.when(t == pl.num_programs(1) - 1)
    def _():
        out_ref[...] = acc_ref[...]


# ----------------------------------------------------------------------------
# Tiling: pick a (row_tile, lane_tile) block for a (rows, hw) array.
# Assumes hw % 128 == 0 (wrapper pads).  Row tile is a multiple of 8 dividing
# `rows` (or all of `rows` when rows is not 8-aligned — only happens for tiny
# N*C); lane tile is a multiple of 128 dividing hw.  Blocks grow toward
# _MAX_BLOCK_BYTES so per-step pipeline overhead amortizes.
# ----------------------------------------------------------------------------
def _choose_tiles(rows, hw, itemsize, max_block_bytes=_MAX_BLOCK_BYTES):
    # Lane tile first (bounded assuming at least min(rows, 8) live sublanes).
    max_lane = (max_block_bytes // (itemsize * max(1, min(rows, _SUBLANE)))
                // _LANE) * _LANE
    t = min(hw, max(max_lane, _LANE))
    t = (t // _LANE) * _LANE
    while hw % t != 0:
        t -= _LANE          # terminates: hw % 128 == 0

    # Row tile given the lane tile.
    if rows % _SUBLANE != 0:
        r = rows            # full-extent sublane block (rows is tiny here)
    else:
        max_rows = max(_SUBLANE,
                       (max_block_bytes // (itemsize * t) // _SUBLANE) * _SUBLANE)
        r = min(rows, max_rows)
        while rows % r != 0:
            r -= _SUBLANE   # terminates: rows % 8 == 0
    return r, t


def _apply_affine(x2, loc_rows, scale_rows, r, t):
    rows, hwp = x2.shape
    grid = (rows // r, hwp // t)
    return pl.pallas_call(
        _affine_kernel,
        grid=grid,
        in_specs=[pl.BlockSpec((r, t), lambda i, j: (i, j)),
                  pl.BlockSpec((r, 1), lambda i, j: (i, 0)),
                  pl.BlockSpec((r, 1), lambda i, j: (i, 0))],
        out_specs=pl.BlockSpec((r, t), lambda i, j: (i, j)),
        out_shape=jax.ShapeDtypeStruct((rows, hwp), x2.dtype),
        compiler_params=pltpu.CompilerParams(
            dimension_semantics=("parallel", "parallel"),
            vmem_limit_bytes=_VMEM_LIMIT_BYTES),
    )(x2, loc_rows, scale_rows)


def _row_sums(x2, r, t):
    rows, hwp = x2.shape
    grid = (rows // r, hwp // t)
    return pl.pallas_call(
        _row_sum_kernel,
        grid=grid,
        in_specs=[pl.BlockSpec((r, t), lambda i, j: (i, j))],
        out_specs=pl.BlockSpec((r, 1), lambda i, j: (i, 0)),
        out_shape=jax.ShapeDtypeStruct((rows, 1), jnp.float32),
        scratch_shapes=[pltpu.VMEM((r, 1), jnp.float32)],
        compiler_params=pltpu.CompilerParams(
            dimension_semantics=("arbitrary", "arbitrary"),
            vmem_limit_bytes=_VMEM_LIMIT_BYTES),
    )(x2)


def _row_sq_devs(x2, mu_rows, r, t):
    rows, hwp = x2.shape
    grid = (rows // r, hwp // t)
    return pl.pallas_call(
        _row_sq_dev_kernel,
        grid=grid,
        in_specs=[pl.BlockSpec((r, t), lambda i, j: (i, j)),
                  pl.BlockSpec((r, 1), lambda i, j: (i, 0))],
        out_specs=pl.BlockSpec((r, 1), lambda i, j: (i, 0)),
        out_shape=jax.ShapeDtypeStruct((rows, 1), jnp.float32),
        scratch_shapes=[pltpu.VMEM((r, 1), jnp.float32)],
        compiler_params=pltpu.CompilerParams(
            dimension_semantics=("arbitrary", "arbitrary"),
            vmem_limit_bytes=_VMEM_LIMIT_BYTES),
    )(x2, mu_rows)


def actnorm_forward(x, loc, scale, initialized, logdet=True):
    """ActNorm forward. x: (N, C, H, W); loc/scale: (1, C, 1, 1).

    `initialized` is a Python int (trace-time specialization): 0 -> perform the
    data-dependent initialization of loc/scale, otherwise use the given ones.
    Returns ((out, logdet), loc_new, scale_new) or (out, loc_new, scale_new).
    """
    N, C, H, W = x.shape
    HW = H * W
    rows = N * C
    itemsize = jnp.dtype(x.dtype).itemsize

    # Free reshape to packed 2D (N*C, HW); pad the lane axis to a multiple of
    # 128 only when needed (padded lanes are sliced off on output).
    hw_pad = ((HW + _LANE - 1) // _LANE) * _LANE
    x3 = x.reshape(N, C, HW)
    if hw_pad != HW:
        x3 = jnp.pad(x3, ((0, 0), (0, 0), (0, hw_pad - HW)))
    x2 = x3.reshape(rows, hw_pad)

    r, t = _choose_tiles(rows, hw_pad, itemsize)

    if initialized == 0:
        # Two-pass per-channel stats (numerically safe; runs once ever).
        m = float(N * HW)                                    # true element count
        chan_sum = _row_sums(x2, r, t).reshape(N, C).sum(axis=0)      # (C,)
        mean_c = chan_sum / m
        mu_rows = jnp.tile(mean_c.reshape(C, 1), (N, 1))               # (N*C, 1)
        chan_ss = _row_sq_devs(x2, mu_rows, r, t).reshape(N, C).sum(axis=0)
        # Each zero-padded lane contributed (0 - mean)^2; remove it exactly.
        pad_count = float(N * (hw_pad - HW))
        chan_ss = chan_ss - pad_count * mean_c * mean_c
        var = chan_ss / max(m - 1.0, 1.0)                    # unbiased, guarded
        std = jnp.sqrt(jnp.maximum(var, 0.0))
        loc_c = -mean_c
        scale_c = 1.0 / (std + 1e-6)
    else:
        loc_c = loc.reshape(C).astype(jnp.float32)
        scale_c = scale.reshape(C).astype(jnp.float32)

    # Per-row parameters (tiny, built once per call).
    loc_rows = jnp.tile(loc_c.reshape(C, 1), (N, 1))
    scale_rows = jnp.tile(scale_c.reshape(C, 1), (N, 1))

    out2 = _apply_affine(x2, loc_rows, scale_rows, r, t)
    out = out2.reshape(N, C, hw_pad)
    if hw_pad != HW:
        out = out[:, :, :HW]
    out = out.reshape(N, C, H, W)

    loc_new = loc_c.reshape(1, C, 1, 1)
    scale_new = scale_c.reshape(1, C, 1, 1)

    if logdet:
        # Tiny C-element reduction: plain jnp, no extra kernel launch.
        logdet_val = jnp.float32(HW) * jnp.sum(jnp.log(jnp.abs(scale_c)))
        return (out, logdet_val), loc_new, scale_new
    return out, loc_new, scale_new


def _reference_numpy(x, H, W):
    # Mirrors the PyTorch first-call (uninitialized) forward, in float64.
    xn = np.asarray(x, dtype=np.float64)
    N, C, _, _ = xn.shape
    flat = np.transpose(xn, (1, 0, 2, 3)).reshape(C, -1)
    mean = flat.mean(axis=1)
    std = flat.std(axis=1, ddof=1)                 # torch.std -> unbiased
    loc = (-mean).reshape(1, C, 1, 1)
    scale = (1.0 / (std + 1e-6)).reshape(1, C, 1, 1)
    out = scale * (xn + loc)
    logdet = H * W * np.sum(np.log(np.abs(scale)))
    return out, logdet


if __name__ == "__main__":
    key0, key1 = jax.random.split(jax.random.PRNGKey(0))

    # --- Main case: N=2, C=4, 16x16 --------------------------------------
    N, C, H, W = 2, 4, 16, 16
    x = jax.random.normal(key0, (N, C, H, W), dtype=jnp.float32) * 2.0 + 0.5
    loc0 = jnp.zeros((1, C, 1, 1), dtype=jnp.float32)
    scale0 = jnp.ones((1, C, 1, 1), dtype=jnp.float32)

    # First call: data-dependent initialization path.
    (out, logdet_v), loc_new, scale_new = actnorm_forward(
        x, loc0, scale0, initialized=0, logdet=True)
    jax.block_until_ready(out)
    jax.block_until_ready(logdet_v)

    ref_out, ref_logdet = _reference_numpy(np.asarray(x), H, W)
    np.testing.assert_allclose(np.asarray(out), ref_out, rtol=1e-4, atol=1e-4)
    np.testing.assert_allclose(float(logdet_v), ref_logdet, rtol=1e-4, atol=1e-4)

    # Second call: steady-state (initialized) hot path with the learned params.
    (out2, logdet_v2), _, _ = actnorm_forward(
        x, loc_new, scale_new, initialized=1, logdet=True)
    jax.block_until_ready(out2)
    np.testing.assert_allclose(np.asarray(out2), ref_out, rtol=1e-4, atol=1e-4)
    np.testing.assert_allclose(float(logdet_v2), ref_logdet, rtol=1e-4, atol=1e-4)

    # --- Robustness case: C not 8-aligned, H*W not 128-divisible ----------
    N2, C2, H2, W2 = 2, 3, 10, 10
    x_odd = jax.random.normal(key1, (N2, C2, H2, W2), dtype=jnp.float32) * 0.7 - 1.3
    (out3, logdet_v3), _, _ = actnorm_forward(
        x_odd, jnp.zeros((1, C2, 1, 1), jnp.float32),
        jnp.ones((1, C2, 1, 1), jnp.float32), initialized=0, logdet=True)
    jax.block_until_ready(out3)
    ref3, ref_ld3 = _reference_numpy(np.asarray(x_odd), H2, W2)
    np.testing.assert_allclose(np.asarray(out3), ref3, rtol=1e-4, atol=1e-4)
    np.testing.assert_allclose(float(logdet_v3), ref_ld3, rtol=1e-4, atol=1e-4)

    print("KERNEL_OK")
</pallas_src>

<mosaic_0001>
module attributes {stable_mosaic.version = 11 : i64} {
  func.func @_row_sum_kernel(%arg0: i32, %arg1: i32, %arg2: memref<8x256xf32, #tpu.memory_space<vmem>>, %arg3: memref<8x1xf32, #tpu.memory_space<vmem>>, %arg4: memref<8x1xf32, #tpu.memory_space<vmem>>) attributes {dimension_semantics = [#tpu.dimension_semantics<arbitrary>, #tpu.dimension_semantics<arbitrary>], iteration_bounds = array<i64: 1, 1>, scalar_prefetch = 0 : i64, scratch_operands = 1 : i64, tpu.core_type = #tpu.core_type<tc>, window_params = [{transform_indices = @transform_0, window_bounds = array<i64: 8, 256>}, {transform_indices = @transform_1, window_bounds = array<i64: 8, 1>}]} {
    %c0_i32 = arith.constant 0 : i32
    %0 = arith.cmpi eq, %arg1, %c0_i32 : i32
    %1 = arith.extui %0 : i1 to i32
    %c0_i32_0 = arith.constant 0 : i32
    %2 = arith.cmpi ne, %1, %c0_i32_0 : i32
    scf.if %2 {
      %cst_8 = arith.constant 0.000000e+00 : f32
      %12 = vector.broadcast %cst_8 : f32 to vector<8x1xf32>
      %c0_9 = arith.constant 0 : index
      %c0_10 = arith.constant 0 : index
      %13 = vector.load %arg4[%c0_9, %c0_10] : memref<8x1xf32, #tpu.memory_space<vmem>>, vector<8x1xf32>
      tpu.vector_store %arg4[%c0_9, %c0_10], %12 {strides = array<i32>} : memref<8x1xf32, #tpu.memory_space<vmem>>, vector<8x1xf32>,
    } else {
    }
    %c0 = arith.constant 0 : index
    %c0_1 = arith.constant 0 : index
    %3 = vector.load %arg4[%c0, %c0_1] : memref<8x1xf32, #tpu.memory_space<vmem>>, vector<8x1xf32>
    %c0_2 = arith.constant 0 : index
    %c0_3 = arith.constant 0 : index
    %4 = vector.load %arg2[%c0_2, %c0_3] : memref<8x256xf32, #tpu.memory_space<vmem>>, vector<8x256xf32>
    %cst = arith.constant dense<0.000000e+00> : vector<8xf32>
    %5 = vector.multi_reduction <add>, %4, %cst [1] : vector<8x256xf32> to vector<8xf32>
    %6 = vector.shape_cast %5 : vector<8xf32> to vector<8x1xf32>
    %7 = arith.addf %3, %6 : vector<8x1xf32>
    %c0_4 = arith.constant 0 : index
    %c0_5 = arith.constant 0 : index
    %8 = vector.load %arg4[%c0_4, %c0_5] : memref<8x1xf32, #tpu.memory_space<vmem>>, vector<8x1xf32>
    tpu.vector_store %arg4[%c0_4, %c0_5], %7 {strides = array<i32>} : memref<8x1xf32, #tpu.memory_space<vmem>>, vector<8x1xf32>,
    %c0_i32_6 = arith.constant 0 : i32
    %9 = arith.cmpi eq, %arg1, %c0_i32_6 : i32
    %10 = arith.extui %9 : i1 to i32
    %c0_i32_7 = arith.constant 0 : i32
    %11 = arith.cmpi ne, %10, %c0_i32_7 : i32
    scf.if %11 {
      %c0_8 = arith.constant 0 : index
      %c0_9 = arith.constant 0 : index
      %12 = vector.load %arg4[%c0_8, %c0_9] : memref<8x1xf32, #tpu.memory_space<vmem>>, vector<8x1xf32>
      %c0_10 = arith.constant 0 : index
      %c0_11 = arith.constant 0 : index
      %13 = vector.load %arg3[%c0_10, %c0_11] : memref<8x1xf32, #tpu.memory_space<vmem>>, vector<8x1xf32>
      tpu.vector_store %arg3[%c0_10, %c0_11], %12 {strides = array<i32>} : memref<8x1xf32, #tpu.memory_space<vmem>>, vector<8x1xf32>,
    } else {
    }
    return
  }
  func.func @transform_0(%arg0: i32, %arg1: i32) -> (i32, i32) {
    %c0_i32 = arith.constant 0 : i32
    return %arg0, %arg1 : i32, i32
  }
  func.func @transform_1(%arg0: i32, %arg1: i32) -> (i32, i32) {
    %c0_i32 = arith.constant 0 : i32
    %c0_i32_0 = arith.constant 0 : i32
    return %arg0, %c0_i32 : i32, i32
  }
}

</mosaic_0001>

<bundles_post_ra>
// kernel: tpu_custom_call.1
= control target key start
LH: loop header
LB: loop body
LE: loop exit
PB: predicated region body
PF: predicated region fallthrough
CT: control target
= control target key end

     0   :  { %6 = vsyncpa [#allocation4], 0  ;;  %s71_s6 = smov [#allocation3]   ;;  %s98_s0 = inlined_call_operand.hbm [shape: f32[8,256], index: 0, kind: input, shape index: {}]   ;;  %s99_s1 = inlined_call_operand.vmem [shape: f32[8,1], index: 1, kind: output, shape index: {}]  }
   0x1   :  { %s13_s7 = sshll.u32 %s71_s6, 4  ;;  %s47_s10 = scalar_lea.hbm %s98_s0, 256  ;;  %s14_s7 = int_to_ptr.vmem [resolvable:$true] %s13_s7 }
   0x2   :  { %p48_p0 = scmp.ne.s32.totalorder %s98_s0, %s47_s10  ;;  %p51_p1 = scmp.lt.u32.totalorder %s47_s10, %s98_s0 }
   0x4   :  { %p53_p2 = pnand %p51_p1, %p48_p0 }
   0x6   :  { %56 = shalt.err (!%p53_p2)
}
   0x7   :  { %s57_s15 = scalar_lea.vmem %s14_s7, 256  ;;  %p62_p4 = scmp.lt.s32.totalorder %s14_s7, %s14_s7 }
   0x8   :  { %p58_p3 = scmp.ne.s32.totalorder %s14_s7, %s57_s15  ;;  %p63_p5 = scmp.lt.s32.totalorder %s57_s15, %s57_s15 }
   0xa   :  { %p64_p6 = por %p63_p5, %p62_p4 }
   0xc   :  { %p65_p7 = pnand %p64_p6, %p58_p3 }
   0xe   :  { %68 = shalt.err (!%p65_p7)
}
   0xf   :  { %16 = dma.hbm_to_vmem [thread:$0]  %s98_s0, 256, %s14_s7, [#allocation4]  }
  0x10   :  { %69 = dma.done.wait [#allocation4], 256  }
  0x11   :  { %70 = vsyncadd [#allocation4], 4294967040  ;;  %vm24_vm0 = vcmask 7168   ;;  %v72_v0 = vmov 0.0   ;;  %v27_v1 = vld [vmem:[#allocation3] sm:$0xff]  ;;  %v28_v2 = vld [vmem:[#allocation3 + $0x8] sm:$0xff] }
  0x12   :  { %25 = vst.msk [vmem:[#allocation2] sm:$0xff] %vm24_vm0, %v72_v0  ;;  %v29_v3 = vadd.f32 %v28_v2, %v27_v1 }
  0x14   :  { %30 = vadd.xlane.f32.xlu0 %v29_v3 }
  0x19   :  { %v26_v4 = vld [vmem:[#allocation2] sm:$0xff] }
  0xa1   :  { %v31_v5 = vpop.xlane.xlu0 %30 }
  0xa2   :  { %v32_v6 = vadd.f32 %v31_v5, %v26_v4 }
  0xa4   :  { %34 = vst.msk [vmem:[#allocation2] sm:$0xff] %vm24_vm0, %v32_v6 }
  0xab   :  { %v38_v7 = vld [vmem:[#allocation2] sm:$0xff] }
  0xac   :  { %39 = vst.msk [vmem:[%s99_s1] sm:$0xff] %vm24_vm0, %v38_v7 }
  0xad   :  { %44 = vsyncpa [#allocation4], 1 }

</bundles_post_ra>
